<compile_context>
chip_gen: v6e
topology: v6e:2x2x1
jax: 0.10.0
libtpu: 0.0.40
codegen_flags: <defaults>
</compile_context>

<pallas_src>
import functools

import jax
import jax.numpy as jnp
from jax.experimental import pallas as pl
from jax.experimental.pallas import tpu as pltpu


def _round_up(x, m):
    return (x + m - 1) // m * m


def _pad2d(a, rows, cols):
    r, c = a.shape
    if r == rows and c == cols:
        return a
    return jnp.pad(a, ((0, rows - r), (0, cols - c)))


def sage_conv_kernel(*refs, apply_relu, reassociate):
    # reassociate=False ("aggregate-then-project"):
    #   refs = (a, x_msg, x_root, w_l, w_r, bias, inv_deg, out, acc)
    #   acc (tm, f_in)  += A_tile @ X_tile
    #   out = (acc * inv_deg) @ W_l + x_root @ W_r + b
    # reassociate=True  ("project-then-aggregate", Z = X @ W_l hoisted outside):
    #   refs = (a, z_msg, x_root, w_r, bias, inv_deg, out, acc)
    #   acc (tm, f_out) += A_tile @ Z_tile
    #   out = acc * inv_deg + x_root @ W_r + b
    if reassociate:
        (a_ref, msg_ref, xi_ref, wr_ref, b_ref, inv_ref, o_ref, acc_ref) = refs
        wl_ref = None
    else:
        (a_ref, msg_ref, xi_ref, wl_ref, wr_ref, b_ref, inv_ref, o_ref,
         acc_ref) = refs

    k = pl.program_id(1)
    nk = pl.num_programs(1)

    @pl.when(k == 0)
    def _():
        acc_ref[...] = jnp.zeros_like(acc_ref)

    # int8 edge counts -> bf16 for the MXU (cast hidden under the A-tile DMA).
    a = a_ref[...].astype(jnp.bfloat16)
    acc_ref[...] += jnp.dot(a, msg_ref[...],
                            preferred_element_type=jnp.float32)

    @pl.when(k == nk - 1)
    def _():
        inv = inv_ref[...]                     # (tm, 1) f32 = 1 / deg
        root = jnp.dot(xi_ref[...], wr_ref[...],
                       preferred_element_type=jnp.float32)
        if reassociate:
            out = acc_ref[...] * inv + root
        else:
            agg = (acc_ref[...] * inv).astype(jnp.bfloat16)
            out = jnp.dot(agg, wl_ref[...],
                          preferred_element_type=jnp.float32) + root
        out = out + b_ref[...]
        # F.normalize(out, p=2, dim=-1) with torch's 1e-12 clamp:
        #   out / max(||out||, 1e-12) == out * rsqrt(max(||out||^2, 1e-24))
        ssq = jnp.sum(out * out, axis=-1, keepdims=True)
        out = out * jax.lax.rsqrt(jnp.maximum(ssq, 1e-24))
        if apply_relu:
            out = jnp.maximum(out, 0.0)
        o_ref[...] = out.astype(o_ref.dtype)


def sage_conv(adj, inv_deg, x, w_l, w_r, bias, *, apply_relu, tm, tk,
              out_dtype=jnp.float32):
    # adj    : (n_p, n_p) int8 edge counts (A[i, j] = #edges j -> i)
    # inv_deg: (n_p, 1) f32 per-node 1/deg (mean normalization)
    # x      : (n_p, f_in_p) bf16
    # w_l/w_r: (f_in_p, f_out_p) bf16; bias: (1, f_out_p) f32
    n_p, f_in_p = x.shape
    f_out_p = w_l.shape[1]

    # Decide reassociation on PADDED dims: only project-then-aggregate when it
    # actually shrinks the streamed / accumulated width.
    reassociate = f_out_p < f_in_p

    a_spec = pl.BlockSpec((tm, tk), lambda i, k: (i, k))
    xi_spec = pl.BlockSpec((tm, f_in_p), lambda i, k: (i, 0))
    wr_spec = pl.BlockSpec((f_in_p, f_out_p), lambda i, k: (0, 0))
    b_spec = pl.BlockSpec((1, f_out_p), lambda i, k: (0, 0))
    inv_spec = pl.BlockSpec((tm, 1), lambda i, k: (i, 0))

    if reassociate:
        # Hoist Z = X @ W_l ONCE (plain XLA matmul) and stream Z as the
        # k-indexed operand -> no per-row-tile recompute, narrower messages.
        z = jnp.dot(x, w_l,
                    preferred_element_type=jnp.float32).astype(jnp.bfloat16)
        in_specs = [
            a_spec,
            pl.BlockSpec((tk, f_out_p), lambda i, k: (k, 0)),   # Z (messages)
            xi_spec, wr_spec, b_spec, inv_spec,
        ]
        args = (adj, z, x, w_r, bias, inv_deg)
        acc_f = f_out_p
    else:
        in_specs = [
            a_spec,
            pl.BlockSpec((tk, f_in_p), lambda i, k: (k, 0)),    # X (messages)
            xi_spec,
            pl.BlockSpec((f_in_p, f_out_p), lambda i, k: (0, 0)),  # W_l
            wr_spec, b_spec, inv_spec,
        ]
        args = (adj, x, x, w_l, w_r, bias, inv_deg)
        acc_f = f_in_p

    kernel = functools.partial(sage_conv_kernel, apply_relu=apply_relu,
                               reassociate=reassociate)
    grid_spec = pltpu.PrefetchScalarGridSpec(
        num_scalar_prefetch=0,
        grid=(n_p // tm, n_p // tk),
        in_specs=in_specs,
        out_specs=pl.BlockSpec((tm, f_out_p), lambda i, k: (i, 0)),
        scratch_shapes=[pltpu.VMEM((tm, acc_f), jnp.float32)],
    )
    return pl.pallas_call(
        kernel,
        out_shape=jax.ShapeDtypeStruct((n_p, f_out_p), out_dtype),
        grid_spec=grid_spec,
        compiler_params=pltpu.CompilerParams(
            dimension_semantics=("parallel", "arbitrary"),
            vmem_limit_bytes=32 * 1024 * 1024),
    )(*args)


def build_adjacency(edge_index, num_nodes_padded):
    # edge_index: (2, E), row = source j, col = target i (PyG source->target).
    # Adjacency built DIRECTLY as int8 edge counts (no N^2 f32 intermediate);
    # the 1/deg mean scale is applied in f32 inside the kernel epilogue.
    row, col = edge_index[0], edge_index[1]
    e = row.shape[0]
    adj = jnp.zeros((num_nodes_padded, num_nodes_padded), jnp.int8)
    adj = adj.at[col, row].add(jnp.ones((e,), jnp.int8))
    deg = jnp.zeros((num_nodes_padded,), jnp.int32).at[col].add(1)
    inv_deg = (1.0 / jnp.maximum(deg, 1).astype(jnp.float32)).reshape(-1, 1)
    return adj, inv_deg


def graphsage_forward(x, edge_index, params):
    n, in_feats = x.shape
    h_feats = params["w_l1"].shape[1]
    out_feats = params["w_l2"].shape[1]

    # Tile selection: 512 tiles for large graphs (mem-bound kernels hit ~85%
    # of HBM roofline at 512 vs ~63% at 256).  Small graphs split the row axis
    # into >= 2 tiles so the "parallel" i axis shards across both v7x TCs.
    TILE = 512
    n_p = _round_up(n, 128)
    if n_p > TILE:
        n_p = _round_up(n, TILE)
        tm = tk = TILE
    else:
        tk = n_p
        tm = max(n_p // 2, 8)

    f_in_p = _round_up(in_feats, 128)
    h_p = _round_up(h_feats, 128)
    f_out_p = _round_up(out_feats, 128)

    adj, inv_deg = build_adjacency(edge_index, n_p)

    # dropout(p=0.6, training=False) -> identity
    x_p = _pad2d(x, n_p, f_in_p).astype(jnp.bfloat16)

    w_l1 = _pad2d(params["w_l1"], f_in_p, h_p).astype(jnp.bfloat16)
    w_r1 = _pad2d(params["w_r1"], f_in_p, h_p).astype(jnp.bfloat16)
    b1 = _pad2d(params["b1"], 1, h_p).astype(jnp.float32)
    w_l2 = _pad2d(params["w_l2"], h_p, f_out_p).astype(jnp.bfloat16)
    w_r2 = _pad2d(params["w_r2"], h_p, f_out_p).astype(jnp.bfloat16)
    b2 = _pad2d(params["b2"], 1, f_out_p).astype(jnp.float32)

    h = sage_conv(adj, inv_deg, x_p, w_l1, w_r1, b1, apply_relu=True,
                  tm=tm, tk=tk, out_dtype=jnp.bfloat16)
    out = sage_conv(adj, inv_deg, h, w_l2, w_r2, b2, apply_relu=False,
                    tm=tm, tk=tk, out_dtype=jnp.float32)
    return out[:n, :out_feats]


def init_params(key, in_feats, h_feats, out_feats):
    ks = jax.random.split(key, 6)

    def glorot(k, fan_in, fan_out):
        scale = jnp.sqrt(6.0 / (fan_in + fan_out))
        return jax.random.uniform(k, (fan_in, fan_out), jnp.float32, -scale, scale)

    return {
        # conv1: lin_l (with bias) on aggregated msgs, lin_r (no bias) on root
        "w_l1": glorot(ks[0], in_feats, h_feats),
        "w_r1": glorot(ks[1], in_feats, h_feats),
        "b1": jnp.zeros((1, h_feats), jnp.float32),
        # conv2
        "w_l2": glorot(ks[2], h_feats, out_feats),
        "w_r2": glorot(ks[3], h_feats, out_feats),
        "b2": jnp.zeros((1, out_feats), jnp.float32),
    }


if __name__ == "__main__":
    key = jax.random.PRNGKey(0)
    k_x, k_e1, k_e2, k_p = jax.random.split(key, 4)

    num_nodes = 64
    num_edges = 256
    in_feats, h_feats, out_feats = 32, 64, 16

    x = jax.random.normal(k_x, (num_nodes, in_feats), jnp.float32)
    src = jax.random.randint(k_e1, (num_edges,), 0, num_nodes, jnp.int32)
    dst = jax.random.randint(k_e2, (num_edges,), 0, num_nodes, jnp.int32)
    edge_index = jnp.stack([src, dst], axis=0)  # (2, E)

    params = init_params(k_p, in_feats, h_feats, out_feats)

    out = jax.jit(graphsage_forward)(x, edge_index, params)
    jax.block_until_ready(out)
    assert out.shape == (num_nodes, out_feats)
    assert bool(jnp.all(jnp.isfinite(out)))
    print("KERNEL_OK")
</pallas_src>

<mosaic_0001>
module attributes {stable_mosaic.version = 11 : i64} {
  func.func private @main(%arg0: i32) attributes {dimension_semantics = [#tpu.dimension_semantics<core_parallel>], iteration_bounds = array<i64: 2>, tpu.core_type = #tpu.core_type<sc_scalar_subcore>, window_params = []} {
    return
  }
}

module attributes {stable_mosaic.version = 11 : i64} {
  func.func private @main(%arg0: i32) attributes {dimension_semantics = [#tpu.dimension_semantics<core_parallel>], iteration_bounds = array<i64: 2>, tpu.core_type = #tpu.core_type<sc_scalar_subcore>, window_params = []} {
    return
  }
}

module attributes {stable_mosaic.version = 11 : i64} {
  func.func @sage_conv_kernel(%arg0: i32, %arg1: i32, %arg2: memref<64x128xi8, #tpu.memory_space<vmem>>, %arg3: memref<128x128xbf16, #tpu.memory_space<vmem>>, %arg4: memref<64x128xbf16, #tpu.memory_space<vmem>>, %arg5: memref<128x128xbf16, #tpu.memory_space<vmem>>, %arg6: memref<128x128xbf16, #tpu.memory_space<vmem>>, %arg7: memref<1x128xf32, #tpu.memory_space<vmem>>, %arg8: memref<64x1xf32, #tpu.memory_space<vmem>>, %arg9: memref<64x128xbf16, #tpu.memory_space<vmem>>, %arg10: memref<64x128xf32, #tpu.memory_space<vmem>>) attributes {dimension_semantics = [#tpu.dimension_semantics<parallel>, #tpu.dimension_semantics<arbitrary>], iteration_bounds = array<i64: 2, 1>, scalar_prefetch = 0 : i64, scratch_operands = 1 : i64, tpu.core_type = #tpu.core_type<tc>, window_params = [{transform_indices = @transform_0, window_bounds = array<i64: 64, 128>}, {transform_indices = @transform_1, window_bounds = array<i64: 128, 128>}, {transform_indices = @transform_2, window_bounds = array<i64: 64, 128>}, {pipeline_mode = #tpu.pipeline_mode<synchronous>, transform_indices = @transform_3, window_bounds = array<i64: 128, 128>}, {pipeline_mode = #tpu.pipeline_mode<synchronous>, transform_indices = @transform_4, window_bounds = array<i64: 128, 128>}, {pipeline_mode = #tpu.pipeline_mode<synchronous>, transform_indices = @transform_5, window_bounds = array<i64: 1, 128>}, {transform_indices = @transform_6, window_bounds = array<i64: 64, 1>}, {transform_indices = @transform_7, window_bounds = array<i64: 64, 128>}]} {
    %c0_i32 = arith.constant 0 : i32
    %0 = arith.cmpi eq, %arg1, %c0_i32 : i32
    %1 = arith.extui %0 : i1 to i32
    %c0_i32_0 = arith.constant 0 : i32
    %2 = arith.cmpi ne, %1, %c0_i32_0 : i32
    scf.if %2 {
      %cst_10 = arith.constant 0.000000e+00 : f32
      %13 = vector.broadcast %cst_10 : f32 to vector<64x128xf32>
      %c0_11 = arith.constant 0 : index
      %c0_12 = arith.constant 0 : index
      %14 = vector.load %arg10[%c0_11, %c0_12] : memref<64x128xf32, #tpu.memory_space<vmem>>, vector<64x128xf32>
      tpu.vector_store %arg10[%c0_11, %c0_12], %13 {strides = array<i32>} : memref<64x128xf32, #tpu.memory_space<vmem>>, vector<64x128xf32>,
    } else {
    }
    %c0 = arith.constant 0 : index
    %c0_1 = arith.constant 0 : index
    %3 = vector.load %arg2[%c0, %c0_1] : memref<64x128xi8, #tpu.memory_space<vmem>>, vector<64x128xi8>
    %4 = arith.sitofp %3 : vector<64x128xi8> to vector<64x128xbf16>
    %c0_2 = arith.constant 0 : index
    %c0_3 = arith.constant 0 : index
    %5 = vector.load %arg10[%c0_2, %c0_3] : memref<64x128xf32, #tpu.memory_space<vmem>>, vector<64x128xf32>
    %c0_4 = arith.constant 0 : index
    %c0_5 = arith.constant 0 : index
    %6 = vector.load %arg3[%c0_4, %c0_5] : memref<128x128xbf16, #tpu.memory_space<vmem>>, vector<128x128xbf16>
    %cst = arith.constant dense<0.000000e+00> : vector<64x128xf32>
    %7 = tpu.matmul %4, %6, %cst {dimension_numbers = #tpu.dot_dimension_numbers<[1], [0], [0], [1], [0, 0, 1, 1], [], []>} : vector<64x128xbf16>, vector<128x128xbf16>, vector<64x128xf32> -> vector<64x128xf32>
    %8 = arith.addf %5, %7 : vector<64x128xf32>
    %c0_6 = arith.constant 0 : index
    %c0_7 = arith.constant 0 : index
    %9 = vector.load %arg10[%c0_6, %c0_7] : memref<64x128xf32, #tpu.memory_space<vmem>>, vector<64x128xf32>
    tpu.vector_store %arg10[%c0_6, %c0_7], %8 {strides = array<i32>} : memref<64x128xf32, #tpu.memory_space<vmem>>, vector<64x128xf32>,
    %c0_i32_8 = arith.constant 0 : i32
    %10 = arith.cmpi eq, %arg1, %c0_i32_8 : i32
    %11 = arith.extui %10 : i1 to i32
    %c0_i32_9 = arith.constant 0 : i32
    %12 = arith.cmpi ne, %11, %c0_i32_9 : i32
    scf.if %12 {
      %c0_10 = arith.constant 0 : index
      %c0_11 = arith.constant 0 : index
      %13 = vector.load %arg8[%c0_10, %c0_11] : memref<64x1xf32, #tpu.memory_space<vmem>>, vector<64x1xf32>
      %c0_12 = arith.constant 0 : index
      %c0_13 = arith.constant 0 : index
      %14 = vector.load %arg4[%c0_12, %c0_13] : memref<64x128xbf16, #tpu.memory_space<vmem>>, vector<64x128xbf16>
      %c0_14 = arith.constant 0 : index
      %c0_15 = arith.constant 0 : index
      %15 = vector.load %arg6[%c0_14, %c0_15] : memref<128x128xbf16, #tpu.memory_space<vmem>>, vector<128x128xbf16>
      %cst_16 = arith.constant dense<0.000000e+00> : vector<64x128xf32>
      %16 = tpu.matmul %14, %15, %cst_16 {dimension_numbers = #tpu.dot_dimension_numbers<[1], [0], [0], [1], [0, 0, 1, 1], [], []>} : vector<64x128xbf16>, vector<128x128xbf16>, vector<64x128xf32> -> vector<64x128xf32>
      %c0_17 = arith.constant 0 : index
      %c0_18 = arith.constant 0 : index
      %17 = vector.load %arg10[%c0_17, %c0_18] : memref<64x128xf32, #tpu.memory_space<vmem>>, vector<64x128xf32>
      %18 = vector.broadcast %13 : vector<64x1xf32> to vector<64x128xf32>
      %19 = arith.mulf %17, %18 : vector<64x128xf32>
      %20 = arith.truncf %19 : vector<64x128xf32> to vector<64x128xbf16>
      %c0_19 = arith.constant 0 : index
      %c0_20 = arith.constant 0 : index
      %21 = vector.load %arg5[%c0_19, %c0_20] : memref<128x128xbf16, #tpu.memory_space<vmem>>, vector<128x128xbf16>
      %cst_21 = arith.constant dense<0.000000e+00> : vector<64x128xf32>
      %22 = tpu.matmul %20, %21, %cst_21 {dimension_numbers = #tpu.dot_dimension_numbers<[1], [0], [0], [1], [0, 0, 1, 1], [], []>} : vector<64x128xbf16>, vector<128x128xbf16>, vector<64x128xf32> -> vector<64x128xf32>
      %23 = arith.addf %22, %16 : vector<64x128xf32>
      %c0_22 = arith.constant 0 : index
      %c0_23 = arith.constant 0 : index
      %24 = vector.load %arg7[%c0_22, %c0_23] : memref<1x128xf32, #tpu.memory_space<vmem>>, vector<1x128xf32>
      %25 = vector.broadcast %24 : vector<1x128xf32> to vector<64x128xf32>
      %26 = arith.addf %23, %25 : vector<64x128xf32>
      %27 = arith.mulf %26, %26 : vector<64x128xf32>
      %cst_24 = arith.constant dense<0.000000e+00> : vector<64xf32>
      %28 = vector.multi_reduction <add>, %27, %cst_24 [1] : vector<64x128xf32> to vector<64xf32>
      %29 = vector.shape_cast %28 : vector<64xf32> to vector<64x1xf32>
      %cst_25 = arith.constant 1.000000e-24 : f32
      %30 = vector.broadcast %cst_25 : f32 to vector<64x1xf32>
      %31 = arith.maximumf %29, %30 : vector<64x1xf32>
      %32 = math.rsqrt %31 : vector<64x1xf32>
      %33 = vector.broadcast %32 : vector<64x1xf32> to vector<64x128xf32>
      %34 = arith.mulf %26, %33 : vector<64x128xf32>
      %cst_26 = arith.constant 0.000000e+00 : f32
      %35 = vector.broadcast %cst_26 : f32 to vector<64x128xf32>
      %36 = arith.maximumf %34, %35 : vector<64x128xf32>
      %37 = arith.truncf %36 : vector<64x128xf32> to vector<64x128xbf16>
      %c0_27 = arith.constant 0 : index
      %c0_28 = arith.constant 0 : index
      %38 = vector.load %arg9[%c0_27, %c0_28] : memref<64x128xbf16, #tpu.memory_space<vmem>>, vector<64x128xbf16>
      tpu.vector_store %arg9[%c0_27, %c0_28], %37 {strides = array<i32>} : memref<64x128xbf16, #tpu.memory_space<vmem>>, vector<64x128xbf16>,
    } else {
    }
    return
  }
  func.func @transform_0(%arg0: i32, %arg1: i32) -> (i32, i32) {
    %c0_i32 = arith.constant 0 : i32
    return %arg0, %arg1 : i32, i32
  }
  func.func @transform_1(%arg0: i32, %arg1: i32) -> (i32, i32) {
    %c0_i32 = arith.constant 0 : i32
    %c0_i32_0 = arith.constant 0 : i32
    return %arg1, %c0_i32 : i32, i32
  }
  func.func @transform_2(%arg0: i32, %arg1: i32) -> (i32, i32) {
    %c0_i32 = arith.constant 0 : i32
    %c0_i32_0 = arith.constant 0 : i32
    return %arg0, %c0_i32 : i32, i32
  }
  func.func @transform_3(%arg0: i32, %arg1: i32) -> (i32, i32) {
    %c0_i32 = arith.constant 0 : i32
    %c0_i32_0 = arith.constant 0 : i32
    %c0_i32_1 = arith.constant 0 : i32
    return %c0_i32, %c0_i32_0 : i32, i32
  }
  func.func @transform_4(%arg0: i32, %arg1: i32) -> (i32, i32) {
    %c0_i32 = arith.constant 0 : i32
    %c0_i32_0 = arith.constant 0 : i32
    %c0_i32_1 = arith.constant 0 : i32
    return %c0_i32, %c0_i32_0 : i32, i32
  }
  func.func @transform_5(%arg0: i32, %arg1: i32) -> (i32, i32) {
    %c0_i32 = arith.constant 0 : i32
    %c0_i32_0 = arith.constant 0 : i32
    %c0_i32_1 = arith.constant 0 : i32
    return %c0_i32, %c0_i32_0 : i32, i32
  }
  func.func @transform_6(%arg0: i32, %arg1: i32) -> (i32, i32) {
    %c0_i32 = arith.constant 0 : i32
    %c0_i32_0 = arith.constant 0 : i32
    return %arg0, %c0_i32 : i32, i32
  }
  func.func @transform_7(%arg0: i32, %arg1: i32) -> (i32, i32) {
    %c0_i32 = arith.constant 0 : i32
    %c0_i32_0 = arith.constant 0 : i32
    return %arg0, %c0_i32 : i32, i32
  }
}

module attributes {stable_mosaic.version = 11 : i64} {
  func.func @sage_conv_kernel(%arg0: i32, %arg1: i32, %arg2: memref<64x128xi8, #tpu.memory_space<vmem>>, %arg3: memref<128x128xbf16, #tpu.memory_space<vmem>>, %arg4: memref<64x128xbf16, #tpu.memory_space<vmem>>, %arg5: memref<128x128xbf16, #tpu.memory_space<vmem>>, %arg6: memref<128x128xbf16, #tpu.memory_space<vmem>>, %arg7: memref<1x128xf32, #tpu.memory_space<vmem>>, %arg8: memref<64x1xf32, #tpu.memory_space<vmem>>, %arg9: memref<64x128xf32, #tpu.memory_space<vmem>>, %arg10: memref<64x128xf32, #tpu.memory_space<vmem>>) attributes {dimension_semantics = [#tpu.dimension_semantics<parallel>, #tpu.dimension_semantics<arbitrary>], iteration_bounds = array<i64: 2, 1>, scalar_prefetch = 0 : i64, scratch_operands = 1 : i64, tpu.core_type = #tpu.core_type<tc>, window_params = [{transform_indices = @transform_0, window_bounds = array<i64: 64, 128>}, {transform_indices = @transform_1, window_bounds = array<i64: 128, 128>}, {transform_indices = @transform_2, window_bounds = array<i64: 64, 128>}, {pipeline_mode = #tpu.pipeline_mode<synchronous>, transform_indices = @transform_3, window_bounds = array<i64: 128, 128>}, {pipeline_mode = #tpu.pipeline_mode<synchronous>, transform_indices = @transform_4, window_bounds = array<i64: 128, 128>}, {pipeline_mode = #tpu.pipeline_mode<synchronous>, transform_indices = @transform_5, window_bounds = array<i64: 1, 128>}, {transform_indices = @transform_6, window_bounds = array<i64: 64, 1>}, {transform_indices = @transform_7, window_bounds = array<i64: 64, 128>}]} {
    %c0_i32 = arith.constant 0 : i32
    %0 = arith.cmpi eq, %arg1, %c0_i32 : i32
    %1 = arith.extui %0 : i1 to i32
    %c0_i32_0 = arith.constant 0 : i32
    %2 = arith.cmpi ne, %1, %c0_i32_0 : i32
    scf.if %2 {
      %cst_10 = arith.constant 0.000000e+00 : f32
      %13 = vector.broadcast %cst_10 : f32 to vector<64x128xf32>
      %c0_11 = arith.constant 0 : index
      %c0_12 = arith.constant 0 : index
      %14 = vector.load %arg10[%c0_11, %c0_12] : memref<64x128xf32, #tpu.memory_space<vmem>>, vector<64x128xf32>
      tpu.vector_store %arg10[%c0_11, %c0_12], %13 {strides = array<i32>} : memref<64x128xf32, #tpu.memory_space<vmem>>, vector<64x128xf32>,
    } else {
    }
    %c0 = arith.constant 0 : index
    %c0_1 = arith.constant 0 : index
    %3 = vector.load %arg2[%c0, %c0_1] : memref<64x128xi8, #tpu.memory_space<vmem>>, vector<64x128xi8>
    %4 = arith.sitofp %3 : vector<64x128xi8> to vector<64x128xbf16>
    %c0_2 = arith.constant 0 : index
    %c0_3 = arith.constant 0 : index
    %5 = vector.load %arg10[%c0_2, %c0_3] : memref<64x128xf32, #tpu.memory_space<vmem>>, vector<64x128xf32>
    %c0_4 = arith.constant 0 : index
    %c0_5 = arith.constant 0 : index
    %6 = vector.load %arg3[%c0_4, %c0_5] : memref<128x128xbf16, #tpu.memory_space<vmem>>, vector<128x128xbf16>
    %cst = arith.constant dense<0.000000e+00> : vector<64x128xf32>
    %7 = tpu.matmul %4, %6, %cst {dimension_numbers = #tpu.dot_dimension_numbers<[1], [0], [0], [1], [0, 0, 1, 1], [], []>} : vector<64x128xbf16>, vector<128x128xbf16>, vector<64x128xf32> -> vector<64x128xf32>
    %8 = arith.addf %5, %7 : vector<64x128xf32>
    %c0_6 = arith.constant 0 : index
    %c0_7 = arith.constant 0 : index
    %9 = vector.load %arg10[%c0_6, %c0_7] : memref<64x128xf32, #tpu.memory_space<vmem>>, vector<64x128xf32>
    tpu.vector_store %arg10[%c0_6, %c0_7], %8 {strides = array<i32>} : memref<64x128xf32, #tpu.memory_space<vmem>>, vector<64x128xf32>,
    %c0_i32_8 = arith.constant 0 : i32
    %10 = arith.cmpi eq, %arg1, %c0_i32_8 : i32
    %11 = arith.extui %10 : i1 to i32
    %c0_i32_9 = arith.constant 0 : i32
    %12 = arith.cmpi ne, %11, %c0_i32_9 : i32
    scf.if %12 {
      %c0_10 = arith.constant 0 : index
      %c0_11 = arith.constant 0 : index
      %13 = vector.load %arg8[%c0_10, %c0_11] : memref<64x1xf32, #tpu.memory_space<vmem>>, vector<64x1xf32>
      %c0_12 = arith.constant 0 : index
      %c0_13 = arith.constant 0 : index
      %14 = vector.load %arg4[%c0_12, %c0_13] : memref<64x128xbf16, #tpu.memory_space<vmem>>, vector<64x128xbf16>
      %c0_14 = arith.constant 0 : index
      %c0_15 = arith.constant 0 : index
      %15 = vector.load %arg6[%c0_14, %c0_15] : memref<128x128xbf16, #tpu.memory_space<vmem>>, vector<128x128xbf16>
      %cst_16 = arith.constant dense<0.000000e+00> : vector<64x128xf32>
      %16 = tpu.matmul %14, %15, %cst_16 {dimension_numbers = #tpu.dot_dimension_numbers<[1], [0], [0], [1], [0, 0, 1, 1], [], []>} : vector<64x128xbf16>, vector<128x128xbf16>, vector<64x128xf32> -> vector<64x128xf32>
      %c0_17 = arith.constant 0 : index
      %c0_18 = arith.constant 0 : index
      %17 = vector.load %arg10[%c0_17, %c0_18] : memref<64x128xf32, #tpu.memory_space<vmem>>, vector<64x128xf32>
      %18 = vector.broadcast %13 : vector<64x1xf32> to vector<64x128xf32>
      %19 = arith.mulf %17, %18 : vector<64x128xf32>
      %20 = arith.truncf %19 : vector<64x128xf32> to vector<64x128xbf16>
      %c0_19 = arith.constant 0 : index
      %c0_20 = arith.constant 0 : index
      %21 = vector.load %arg5[%c0_19, %c0_20] : memref<128x128xbf16, #tpu.memory_space<vmem>>, vector<128x128xbf16>
      %cst_21 = arith.constant dense<0.000000e+00> : vector<64x128xf32>
      %22 = tpu.matmul %20, %21, %cst_21 {dimension_numbers = #tpu.dot_dimension_numbers<[1], [0], [0], [1], [0, 0, 1, 1], [], []>} : vector<64x128xbf16>, vector<128x128xbf16>, vector<64x128xf32> -> vector<64x128xf32>
      %23 = arith.addf %22, %16 : vector<64x128xf32>
      %c0_22 = arith.constant 0 : index
      %c0_23 = arith.constant 0 : index
      %24 = vector.load %arg7[%c0_22, %c0_23] : memref<1x128xf32, #tpu.memory_space<vmem>>, vector<1x128xf32>
      %25 = vector.broadcast %24 : vector<1x128xf32> to vector<64x128xf32>
      %26 = arith.addf %23, %25 : vector<64x128xf32>
      %27 = arith.mulf %26, %26 : vector<64x128xf32>
      %cst_24 = arith.constant dense<0.000000e+00> : vector<64xf32>
      %28 = vector.multi_reduction <add>, %27, %cst_24 [1] : vector<64x128xf32> to vector<64xf32>
      %29 = vector.shape_cast %28 : vector<64xf32> to vector<64x1xf32>
      %cst_25 = arith.constant 1.000000e-24 : f32
      %30 = vector.broadcast %cst_25 : f32 to vector<64x1xf32>
      %31 = arith.maximumf %29, %30 : vector<64x1xf32>
      %32 = math.rsqrt %31 : vector<64x1xf32>
      %33 = vector.broadcast %32 : vector<64x1xf32> to vector<64x128xf32>
      %34 = arith.mulf %26, %33 : vector<64x128xf32>
      %c0_26 = arith.constant 0 : index
      %c0_27 = arith.constant 0 : index
      %35 = vector.load %arg9[%c0_26, %c0_27] : memref<64x128xf32, #tpu.memory_space<vmem>>, vector<64x128xf32>
      tpu.vector_store %arg9[%c0_26, %c0_27], %34 {strides = array<i32>} : memref<64x128xf32, #tpu.memory_space<vmem>>, vector<64x128xf32>,
    } else {
    }
    return
  }
  func.func @transform_0(%arg0: i32, %arg1: i32) -> (i32, i32) {
    %c0_i32 = arith.constant 0 : i32
    return %arg0, %arg1 : i32, i32
  }
  func.func @transform_1(%arg0: i32, %arg1: i32) -> (i32, i32) {
    %c0_i32 = arith.constant 0 : i32
    %c0_i32_0 = arith.constant 0 : i32
    return %arg1, %c0_i32 : i32, i32
  }
  func.func @transform_2(%arg0: i32, %arg1: i32) -> (i32, i32) {
    %c0_i32 = arith.constant 0 : i32
    %c0_i32_0 = arith.constant 0 : i32
    return %arg0, %c0_i32 : i32, i32
  }
  func.func @transform_3(%arg0: i32, %arg1: i32) -> (i32, i32) {
    %c0_i32 = arith.constant 0 : i32
    %c0_i32_0 = arith.constant 0 : i32
    %c0_i32_1 = arith.constant 0 : i32
    return %c0_i32, %c0_i32_0 : i32, i32
  }
  func.func @transform_4(%arg0: i32, %arg1: i32) -> (i32, i32) {
    %c0_i32 = arith.constant 0 : i32
    %c0_i32_0 = arith.constant 0 : i32
    %c0_i32_1 = arith.constant 0 : i32
    return %c0_i32, %c0_i32_0 : i32, i32
  }
  func.func @transform_5(%arg0: i32, %arg1: i32) -> (i32, i32) {
    %c0_i32 = arith.constant 0 : i32
    %c0_i32_0 = arith.constant 0 : i32
    %c0_i32_1 = arith.constant 0 : i32
    return %c0_i32, %c0_i32_0 : i32, i32
  }
  func.func @transform_6(%arg0: i32, %arg1: i32) -> (i32, i32) {
    %c0_i32 = arith.constant 0 : i32
    %c0_i32_0 = arith.constant 0 : i32
    return %arg0, %c0_i32 : i32, i32
  }
  func.func @transform_7(%arg0: i32, %arg1: i32) -> (i32, i32) {
    %c0_i32 = arith.constant 0 : i32
    %c0_i32_0 = arith.constant 0 : i32
    return %arg0, %c0_i32 : i32, i32
  }
}

</mosaic_0001>

<bundles_post_ra>
// kernel: graphsage_forward.3
= control target key start
LH: loop header
LB: loop body
LE: loop exit
PB: predicated region body
PF: predicated region fallthrough
CT: control target
= control target key end

     0   :  { %s1425_s24 = smov 0   ;;  %s1427_s25 = smov 0   ;;  %s1579_s0 = inlined_call_operand.vmem [shape: s8[128,128], index: 0, kind: input, shape index: {}]   ;;  %s1580_s1 = inlined_call_operand.vmem [shape: bf16[128,128], index: 1, kind: input, shape index: {}, may-alias: {1,2}]   ;;  %s1581_s2 = inlined_call_operand.vmem [shape: bf16[128,128], index: 2, kind: input, shape index: {}, may-alias: {1,2}]   ;;  %s1582_s3 = inlined_call_operand.vmem [shape: bf16[128,128], index: 3, kind: input, shape index: {}]   ;;  %s1583_s4 = inlined_call_operand.vmem [shape: bf16[128,128], index: 4, kind: input, shape index: {}]   ;;  %s1584_s5 = inlined_call_operand.vmem [shape: f32[1,128], index: 5, kind: input, shape index: {}]   ;;  %s1585_s6 = inlined_call_operand.vmem [shape: f32[128,1], index: 6, kind: input, shape index: {}]   ;;  %s1586_s7 = inlined_call_operand.vmem [shape: f32[128,128], index: 7, kind: output, shape index: {}]  }
   0x1   :  { %s1429_s26 = smov 0  }
   0x2 LB: > { %s29_s27 = sadd.s32 1, %s1378_s25  ;;  %p1121_p0 = scmp.ge.s32.totalorder %s1382_s26, 1  ;;  %s1382_s26 = sphi %s1429_s26, %s17_s26   ;;  %s1378_s25 = sphi %s1427_s25, %s1588_s25   ;;  %s1374_s24 = sphi %s1425_s24, %s1587_s24  }
   0x3   : > { %p31_p1 = scmp.ge.s32.totalorder %s29_s27, 2  ;;  %p288_p2 = scmp.lt.s32.totalorder %s1382_s26, 3 }
   0x5   : > { %s1590_s27 = smov (%p31_p1, %s29_s27), 0  ;;  %p289_p3 = pnand %p1121_p0, %p288_p2 }
   0x6   : > { %s1122_s30 = sshll.u32 (!%p289_p3), %s1374_s24, 3 }
   0x7   : > { %292 = sbr.rel (%p289_p3) target bundleno = 623 (0x26f), region = 48  ;;  %p339_p4 = scmp.lt.s32.totalorder (!%p289_p3), %s1122_s30, 15 }
   0xc   : > { %v1316_v0 = vld [vmem:[%s1580_s1 + $0x38] sm:$0xff]   ;;  %v1317_v1 = vld [vmem:[%s1580_s1 + $0x30] sm:$0xff]   ;;  %s1592_s30 = smov (!%p339_p4, %s1122_s30), 15  ;;  %v1384_v2 = vmov 0   ;;  %v1318_v3 = vld [vmem:[%s1580_s1 + $0x28] sm:$0xff]  }
   0xd   : > { %1201 = vmatprep.subr.bf16.mxu0 %v1316_v0  ;;  %1315 = vset.pattern.permute.xlu1 %v1384_v2  ;;  %s1123_s12 = sshll.u32 %s1592_s30, 1  ;;  %s1127_s16 = sshll.u32 %s1592_s30, 3  ;;  %v1319_v4 = vld [vmem:[%s1580_s1 + $0x20] sm:$0xff]   ;;  %v1320_v12 = vld [vmem:[%s1580_s1 + $0x18] sm:$0xff]   ;;  %v1321_v15 = vld [vmem:[%s1580_s1 + $0x10] sm:$0xff]  }
   0xe   : > { %1202 = vmatpush3.bf16.msra.mxu0 %v1316_v0  ;;  %1314 = vset.pattern.permute.xlu0 %v1384_v2  ;;  %s1458_s15 = scalar_lea.vmem %s1579_s0, %s1123_s12  ;;  %s1466_s19 = scalar_lea.vmem %s1585_s6, %s1127_s16  ;;  %v1324_v16 = vld [vmem:[%s1583_s4 + $0x38] sm:$0xff]   ;;  %v1325_v19 = vld [vmem:[%s1583_s4 + $0x30] sm:$0xff]   ;;  %v1322_v20 = vld [vmem:[%s1580_s1 + $0x8] sm:$0xff]  }
   0xf   : > { %1203 = vmatprep.subr.bf16.mxu0 %v1317_v1  ;;  %v384_v5 = vld [vmem:[%s1458_s15] sm:$0x3]  ;;  %v385_v6 = vld [vmem:[%s1458_s15 + $0x2] sm:$0x3]  ;;  %v585_v13 = vld [vmem:[%s1466_s19 + $0x28] sm:$0xff]  ;;  %1225 = vmatprep.subr.bf16.mxu1 %v1324_v16  ;;  %s1125_s11 = sshll.u32 %s1592_s30, 2  ;;  %s369_s17 = scalar_lea.vmem %s1586_s7, %s1127_s16 }
  0x10   : > { %v392_v7 = vunpack.c.l.s8.bf16 %v384_v5  ;;  %v393_v8 = vunpack.c.l.s8.bf16 %v385_v6  ;;  %v584_v9 = vld [vmem:[%s1466_s19 + $0x20] sm:$0xff]  ;;  %v581_v14 = vld [vmem:[%s1466_s19 + $0x8] sm:$0xff]  ;;  %v583_v17 = vld [vmem:[%s1466_s19 + $0x18] sm:$0xff]  ;;  %1226 = vmatpush3.bf16.msra.mxu1 %v1324_v16  ;;  %s1500_s18 = scalar_lea.vmem %s1581_s2, %s1125_s11 }
  0x11   : > { %779 = vperm.xlu1 %1315, %v584_v9   ;;  %v580_v11 = vld [vmem:[%s1466_s19] sm:$0xff]  ;;  %v582_v18 = vld [vmem:[%s1466_s19 + $0x10] sm:$0xff]  ;;  %v587_v21 = vld [vmem:[%s1466_s19 + $0x38] sm:$0xff]  ;;  %1227 = vmatprep.subr.bf16.mxu1 %v1325_v19 }
  0x12   : > { %1204 = vmatpush3.bf16.msra.mxu0 %v1317_v1  ;;  %v1130_v10 = vcombine.low %v392_v7, %v393_v8  ;;  %759 = vperm.xlu0 %1314, %v580_v11   ;;  %v586_v22 = vld [vmem:[%s1466_s19 + $0x30] sm:$0xff]  ;;  %v386_v23 = vld [vmem:[%s1458_s15 + $0x4] sm:$0x3]  ;;  %v387_v24 = vld [vmem:[%s1458_s15 + $0x6] sm:$0x3] }
  0x13   : > { %1205 = vmatprep.subr.bf16.mxu0 %v1318_v3  ;;  %v1326_v25 = vld [vmem:[%s1583_s4 + $0x28] sm:$0xff]   ;;  %v1323_v26 = vld [vmem:[%s1580_s1] sm:$0xff]   ;;  %v394_v31 = vunpack.c.l.s8.bf16 %v386_v23  ;;  %v395_v32 = vunpack.c.l.s8.bf16 %v387_v24  ;;  %v1328_v35 = vld [vmem:[%s1583_s4 + $0x18] sm:$0xff]  }
  0x14   : > { %1217 = vmatprep.mubr.bf16.mxu0 %v1130_v10  ;;  %v388_v27 = vld [vmem:[%s1458_s15 + $0x8] sm:$0x3]  ;;  %1228 = vmatpush3.bf16.msra.mxu1 %v1325_v19  ;;  %v1327_v28 = vld [vmem:[%s1583_s4 + $0x20] sm:$0xff]   ;;  %v389_v30 = vld [vmem:[%s1458_s15 + $0xa] sm:$0x3] }
  0x15   : > { %784 = vperm.xlu1 %1315, %v585_v13   ;;  %v1333_v29 = vld [vmem:[%s1500_s18] sm:$0xff]   ;;  %1229 = vmatprep.subr.bf16.mxu1 %v1326_v25  ;;  %v396_v33 = vunpack.c.l.s8.bf16 %v388_v27  ;;  %v397_v34 = vunpack.c.l.s8.bf16 %v389_v30  ;;  %v1332_v36 = vld [vmem:[%s1582_s3 + $0x38] sm:$0xff]   ;;  %v390_v37 = vld [vmem:[%s1458_s15 + $0xc] sm:$0x3]  ;;  %v1131_v39 = vcombine.low %v394_v31, %v395_v32 }
  0x16   : > { %1206 = vmatpush3.bf16.msra.mxu0 %v1318_v3  ;;  %764 = vperm.xlu0 %1314, %v581_v14   ;;  %v391_v38 = vld [vmem:[%s1458_s15 + $0xe] sm:$0x3]  ;;  %v1329_v41 = vld [vmem:[%s1583_s4 + $0x10] sm:$0xff]   ;;  %v398_v43 = vunpack.c.l.s8.bf16 %v390_v37  ;;  %v1331_v48 = vld [vmem:[%s1583_s4] sm:$0xff]  }
  0x17   : > { %1207 = vmatprep.subr.bf16.mxu0 %v1319_v4  ;;  %1241 = vmatprep.mubr.bf16.mxu1 %v1333_v29  ;;  %v1132_v40 = vcombine.low %v396_v33, %v397_v34  ;;  %v1335_v42 = vld [vmem:[%s1582_s3 + $0x30] sm:$0xff]   ;;  %v399_v44 = vunpack.c.l.s8.bf16 %v391_v38  ;;  %v1330_v45 = vld [vmem:[%s1583_s4 + $0x8] sm:$0xff]   ;;  %v1337_v49 = vld [vmem:[%s1582_s3 + $0x20] sm:$0xff]  }
  0x18   : > { %1230 = vmatpush3.bf16.msra.mxu1 %v1326_v25  ;;  %v1336_v46 = vld [vmem:[%s1582_s3 + $0x28] sm:$0xff]   ;;  %v1338_v51 = vld [vmem:[%s1582_s3 + $0x18] sm:$0xff]   ;;  %v1339_v52 = vld [vmem:[%s1582_s3 + $0x10] sm:$0xff]  }
  0x19   : > { %774 = vperm.xlu1 %1315, %v583_v17   ;;  %1231 = vmatprep.subr.bf16.mxu1 %v1327_v28  ;;  %v1133_v47 = vcombine.low %v398_v43, %v399_v44  ;;  %v1334_v50 = vld [vmem:[%s1500_s18 + $0x8] sm:$0xff]   ;;  %v1341_v54 = vld [vmem:[%s1500_s18 + $0x10] sm:$0xff]   ;;  %v1342_v55 = vld [vmem:[%s1500_s18 + $0x18] sm:$0xff]  }
  0x1a   : > { %1208 = vmatpush3.bf16.msra.mxu0 %v1319_v4  ;;  %769 = vperm.xlu0 %1314, %v582_v18   ;;  %v1340_v53 = vld [vmem:[%s1582_s3 + $0x8] sm:$0xff]   ;;  %v1343_v56 = vld [vmem:[%s1582_s3] sm:$0xff]  }
  0x1b   : > { %1209 = vmatprep.subr.bf16.mxu0 %v1320_v12 }
  0x1c   : > { %1232 = vmatpush3.bf16.msra.mxu1 %v1327_v28  ;;  %v1162_v28 = vld [vmem:[%s1584_s5] ss:$0 sm:$0xff] }
  0x1d   : > { %794 = vperm.xlu1 %1315, %v587_v21   ;;  %1233 = vmatprep.subr.bf16.mxu1 %v1328_v35 }
  0x1e   : > { %1210 = vmatpush3.bf16.msra.mxu0 %v1320_v12  ;;  %789 = vperm.xlu0 %1314, %v586_v22  }
  0x1f   : > { %1211 = vmatprep.subr.bf16.mxu0 %v1321_v15 }
  0x20   : > { %1234 = vmatpush3.bf16.msra.mxu1 %v1328_v35 }
  0x21   : > { %1235 = vmatprep.subr.bf16.mxu1 %v1329_v41 }
  0x22   : > { %1212 = vmatpush3.bf16.msra.mxu0 %v1321_v15 }
  0x23   : > { %1213 = vmatprep.subr.bf16.mxu0 %v1322_v20 }
  0x24   : > { %1236 = vmatpush3.bf16.msra.mxu1 %v1329_v41 }
  0x25   : > { %1237 = vmatprep.subr.bf16.mxu1 %v1330_v45 }
  0x26   : > { %1214 = vmatpush3.bf16.msra.mxu0 %v1322_v20 }
  0x27   : > { %1215 = vmatprep.subr.bf16.mxu0 %v1323_v26 }
  0x28   : > { %1238 = vmatpush3.bf16.msra.mxu1 %v1330_v45 }
  0x29   : > { %1239 = vmatprep.subr.bf16.mxu1 %v1331_v48 }
  0x2a   : > { %1216 = vmatpush3.bf16.msra.mxu0 %v1323_v26 }
  0x2b   : > { %1249 = vmatprep.subr.bf16.mxu0 %v1332_v36 }
  0x2c   : > { %1240 = vmatpush3.bf16.msra.mxu1 %v1331_v48 }
  0x2d   : > { %1218 = vmatmul.mubr.bf16.vlgmr.msra.gmra.mxu0 %v1131_v39  ;;  %1273 = vmatprep.subr.bf16.mxu1 %v1332_v36 }
  0x2e   : > { %1221 = vmatprep.mubr.bf16.mxu0 %v1132_v40  ;;  %1250 = vmatpush3.bf16.msra.mxu0 %v1332_v36 }
  0x2f   : > { %1251 = vmatprep.subr.bf16.mxu0 %v1335_v42  ;;  %1242 = vmatmul.mubr.bf16.vlgmr.msra.gmra.mxu1 %v1334_v50 }
  0x30   : > { %1281 = vmatpush3.bf16.msra.mxu1 %v1332_v36  ;;  %1245 = vmatprep.mubr.bf16.mxu1 %v1341_v54 }
  0x31   : > { %1274 = vmatprep.subr.bf16.mxu1 %v1335_v42 }
  0x32   : > { %1252 = vmatpush3.bf16.msra.mxu0 %v1335_v42 }
  0x33   : > { %1253 = vmatprep.subr.bf16.mxu0 %v1336_v46 }
  0x34   : > { %1282 = vmatpush3.bf16.msra.mxu1 %v1335_v42 }
  0x35   : > { %1222 = vmatmul.mubr.bf16.gmra.mxu0 %v1133_v47  ;;  %1275 = vmatprep.subr.bf16.mxu1 %v1336_v46 }
  0x36   : > { %1254 = vmatpush3.bf16.msra.mxu0 %v1336_v46 }
  0x37   : > { %1255 = vmatprep.subr.bf16.mxu0 %v1337_v49  ;;  %1246 = vmatmul.mubr.bf16.gmra.mxu1 %v1342_v55 }
  0x38   : > { %1283 = vmatpush3.bf16.msra.mxu1 %v1336_v46 }
  0x39   : > { %1276 = vmatprep.subr.bf16.mxu1 %v1337_v49 }
  0x3a   : > { %1256 = vmatpush3.bf16.msra.mxu0 %v1337_v49 }
  0x3b   : > { %1257 = vmatprep.subr.bf16.mxu0 %v1338_v51 }
  0x3c   : > { %1284 = vmatpush3.bf16.msra.mxu1 %v1337_v49 }
  0x3d   : > { %1277 = vmatprep.subr.bf16.mxu1 %v1338_v51 }
  0x3e   : > { %1258 = vmatpush3.bf16.msra.mxu0 %v1338_v51 }
  0x3f   : > { %1259 = vmatprep.subr.bf16.mxu0 %v1339_v52 }
  0x40   : > { %1285 = vmatpush3.bf16.msra.mxu1 %v1338_v51 }
  0x41   : > { %1278 = vmatprep.subr.bf16.mxu1 %v1339_v52 }
  0x42   : > { %1260 = vmatpush3.bf16.msra.mxu0 %v1339_v52 }
  0x43   : > { %1261 = vmatprep.subr.bf16.mxu0 %v1340_v53 }
  0x44   : > { %1286 = vmatpush3.bf16.msra.mxu1 %v1339_v52 }
  0x45   : > { %1279 = vmatprep.subr.bf16.mxu1 %v1340_v53 }
  0x46   : > { %1262 = vmatpush3.bf16.msra.mxu0 %v1340_v53 }
  0x47   : > { %1263 = vmatprep.subr.bf16.mxu0 %v1343_v56 }
  0x48   : > { %1287 = vmatpush3.bf16.msra.mxu1 %v1340_v53 }
  0x49   : > { %1280 = vmatprep.subr.bf16.mxu1 %v1343_v56 }
  0x4a   : > { %1264 = vmatpush3.bf16.msra.mxu0 %v1343_v56 }
  0x4c   : > { %1288 = vmatpush3.bf16.msra.mxu1 %v1343_v56 }
  0x8c   : > { %v780_v57 = vpop.permute.xlu1 %779 }
  0x8d   : > { %v760_v58 = vpop.permute.xlu0 %759 }
  0x90   : > { %v785_v59 = vpop.permute.xlu1 %784 }
  0x91   : > { %v765_v61 = vpop.permute.xlu0 %764 }
  0x94   : > { %v775_v0 = vpop.permute.xlu1 %774 }
  0x95   : > { %v770_v3 = vpop.permute.xlu0 %769 }
  0x98   : > { %v795_v12 = vpop.permute.xlu1 %794 }
  0x99   : > { %v790_v15 = vpop.permute.xlu0 %789 }
  0xed   : > { %v1219_v60 = vpop.f32.mrf.mxu0 }
  0xee   : > { %v799_v6 = vmul.f32 %v1219_v60, %v770_v3 }
  0xef   : > { %v530_v62 = vpop.f32.mrf.mxu0  ;;  %v1243_v21 = vpop.f32.mrf.mxu1 }
  0xf0   : > { %v797_v4 = vmul.f32 %v760_v58, %v530_v62 }
  0xf1   : > { %v1220_v63 = vpop.f32.mrf.mxu0  ;;  %v718_v22 = vpop.f32.mrf.mxu1 }
  0xf2   : > { %v800_v1 = vmul.f32 %v1220_v63, %v775_v0 }
  0xf3   : > { %v533_v2 = vpop.f32.mrf.mxu0  ;;  %v1244_v23 = vpop.f32.mrf.mxu1 }
  0xf4   : > { %v798_v5 = vmul.f32 %v765_v61, %v533_v2  ;;  %v806_v9 = vpack.c.bf16 %v800_v1, %v799_v6 }
  0xf5   : > { %v1223_v7 = vpop.f32.mrf.mxu0  ;;  %v721_v24 = vpop.f32.mrf.mxu1 }
  0xf6   : > { %v805_v8 = vpack.c.bf16 %v798_v5, %v797_v4  ;;  %v803_v18 = vmul.f32 %v1223_v7, %v790_v15 }
  0xf7   : > { %v546_v10 = vpop.f32.mrf.mxu0  ;;  %v1247_v25 = vpop.f32.mrf.mxu1 }
  0xf8   : > { %1265 = vmatprep.mubr.bf16.mxu0 %v805_v8  ;;  %v801_v16 = vmul.f32 %v780_v57, %v546_v10 }
  0xf9   : > { %v1224_v11 = vpop.f32.mrf.mxu0  ;;  %1266 = vmatmul.mubr.bf16.vlgmr.msra.gmra.mxu0 %v806_v9  ;;  %v734_v26 = vpop.f32.mrf.mxu1 }
  0xfa   : > { %v804_v13 = vmul.f32 %v1224_v11, %v795_v12 }
  0xfb   : > { %v549_v14 = vpop.f32.mrf.mxu0  ;;  %v1248_v30 = vpop.f32.mrf.mxu1 }
  0xfc   : > { %v802_v17 = vmul.f32 %v785_v59, %v549_v14  ;;  %v808_v20 = vpack.c.bf16 %v804_v13, %v803_v18 }
  0xfd   : > { %v737_v38 = vpop.f32.mrf.mxu1 }
  0xfe   : > { %v807_v19 = vpack.c.bf16 %v802_v17, %v801_v16 }
 0x100   : > { %1269 = vmatprep.mubr.bf16.mxu1 %v807_v19 }
 0x101   : > { %1270 = vmatmul.mubr.bf16.vlgmr.msra.gmra.mxu1 %v808_v20 }
 0x1b9   : > { %v1267_v27 = vpop.f32.mrf.mxu0 }
 0x1ba   : > { %v916_v29 = vadd.f32 %v1267_v27, %v1243_v21 }
 0x1bb   : > { %v907_v31 = vpop.f32.mrf.mxu0 }
 0x1bc   : > { %v947_v32 = vadd.f32 %v1162_v28, %v916_v29  ;;  %v908_v33 = vadd.f32 %v907_v31, %v718_v22 }
 0x1bd   : > { %v1268_v34 = vpop.f32.mrf.mxu0 }
 0x1be   : > { %v1560_v35 = vadd.f32 %v1162_v28, %v908_v33  ;;  %v919_v36 = vadd.f32 %v1268_v34, %v1244_v23  ;;  %v955_v37 = vmul.f32 %v947_v32, %v947_v32 }
 0x1bf   : > { %v910_v39 = vpop.f32.mrf.mxu0 }
 0x1c0   : > { %v911_v40 = vadd.f32 %v910_v39, %v721_v24  ;;  %965 = vadd.xlane.f32.xlu0 %v955_v37  ;;  %v948_v42 = vadd.f32 %v1162_v28, %v919_v36  ;;  %v953_v44 = vmul.f32 %v1560_v35, %v1560_v35 }
 0x1c1   : > { %v1271_v41 = vpop.f32.mrf.mxu1 }
 0x1c2   : > { %v946_v43 = vadd.f32 %v1162_v28, %v911_v40  ;;  %v932_v46 = vadd.f32 %v1271_v41, %v1247_v25  ;;  %v956_v51 = vmul.f32 %v948_v42, %v948_v42 }
 0x1c3   : > { %v923_v45 = vpop.f32.mrf.mxu1 }
 0x1c4   : > { %v924_v47 = vadd.f32 %v923_v45, %v734_v26  ;;  %961 = vadd.xlane.f32.xlu0 %v953_v44  ;;  %v954_v48 = vmul.f32 %v946_v43, %v946_v43  ;;  %v951_v53 = vadd.f32 %v1162_v28, %v932_v46 }
 0x1c5   : > { %v1272_v49 = vpop.f32.mrf.mxu1 }
 0x1c6   : > { %v949_v50 = vadd.f32 %v1162_v28, %v924_v47  ;;  %963 = vadd.xlane.f32.xlu1 %v954_v48  ;;  %v935_v54 = vadd.f32 %v1272_v49, %v1248_v30  ;;  %v959_v60 = vmul.f32 %v951_v53, %v951_v53 }
 0x1c7   : > { %v926_v52 = vpop.f32.mrf.mxu1 }
 0x1c8   : > { %v927_v55 = vadd.f32 %v926_v52, %v737_v38  ;;  %967 = vadd.xlane.f32.xlu0 %v956_v51  ;;  %v957_v56 = vmul.f32 %v949_v50, %v949_v50  ;;  %v952_v58 = vadd.f32 %v1162_v28, %v935_v54 }
 0x1ca   : > { %v950_v57 = vadd.f32 %v1162_v28, %v927_v55  ;;  %969 = vadd.xlane.f32.xlu1 %v957_v56  ;;  %v960_v61 = vmul.f32 %v952_v58, %v952_v58 }
 0x1cc   : > { %v958_v59 = vmul.f32 %v950_v57, %v950_v57 }
 0x1ce   : > { %971 = vadd.xlane.f32.xlu0 %v958_v59  ;;  %973 = vadd.xlane.f32.xlu1 %v959_v60 }
 0x1d2   : > { %975 = vadd.xlane.f32.xlu0 %v960_v61 }
 0x249   : > { %v966_v62 = vpop.xlane.xlu0 %965 }
 0x24a   : > { %v979_v63 = vmax.f32 %v966_v62, 1e-24 }
 0x24c   : > { %1344 = vrsqrt.f32 %v979_v63 }
 0x24d   : > { %v962_v0 = vpop.xlane.xlu0 %961 }
 0x24e   : > { %v977_v1 = vmax.f32 %v962_v0, 1e-24 }
 0x24f   : > { %v964_v2 = vpop.xlane.xlu1 %963 }
 0x250   : > { %1346 = vrsqrt.f32 %v977_v1  ;;  %v978_v3 = vmax.f32 %v964_v2, 1e-24 }
 0x251   : > { %v968_v4 = vpop.xlane.xlu0 %967 }
 0x252   : > { %1348 = vrsqrt.f32 %v978_v3  ;;  %v980_v5 = vmax.f32 %v968_v4, 1e-24 }
 0x253   : > { %v970_v6 = vpop.xlane.xlu1 %969 }
 0x254   : > { %1350 = vrsqrt.f32 %v980_v5  ;;  %v981_v7 = vmax.f32 %v970_v6, 1e-24 }
 0x256   : > { %1352 = vrsqrt.f32 %v981_v7 }
 0x257   : > { %v972_v8 = vpop.xlane.xlu0 %971  ;;  %v974_v9 = vpop.xlane.xlu1 %973 }
 0x258   : > { %v982_v10 = vmax.f32 %v972_v8, 1e-24  ;;  %v983_v11 = vmax.f32 %v974_v9, 1e-24 }
 0x259   : > { %v1345_v12 = vpop.eup %1344 }
 0x25a   : > { %v995_v13 = vmul.f32 %v1345_v12, %v947_v32  ;;  %1354 = vrsqrt.f32 %v982_v10 }
 0x25b   : > { %1356 = vrsqrt.f32 %v983_v11  ;;  %v976_v14 = vpop.xlane.xlu0 %975 }
 0x25c   : > { %1003 = vst [vmem:[%s369_s17 + $0x10] sm:$0xff] %v995_v13  ;;  %v984_v15 = vmax.f32 %v976_v14, 1e-24 }
 0x25d   : > { %v1347_v16 = vpop.eup %1346 }
 0x25e   : > { %v993_v17 = vmul.f32 %v1347_v16, %v1560_v35  ;;  %1358 = vrsqrt.f32 %v984_v15 }
 0x25f   : > { %v1349_v18 = vpop.eup %1348 }
 0x260   : > { %1001 = vst [vmem:[%s369_s17] sm:$0xff] %v993_v17  ;;  %v994_v19 = vmul.f32 %v1349_v18, %v946_v43 }
 0x261   : > { %v1351_v20 = vpop.eup %1350 }
 0x262   : > { %1002 = vst [vmem:[%s369_s17 + $0x8] sm:$0xff] %v994_v19  ;;  %v996_v21 = vmul.f32 %v1351_v20, %v948_v42 }
 0x263   : > { %v1353_v22 = vpop.eup %1352 }
 0x264   : > { %1004 = vst [vmem:[%s369_s17 + $0x18] sm:$0xff] %v996_v21  ;;  %v997_v23 = vmul.f32 %v1353_v22, %v949_v50 }
 0x266   : > { %1005 = vst [vmem:[%s369_s17 + $0x20] sm:$0xff] %v997_v23 }
 0x267   : > { %v1355_v24 = vpop.eup %1354 }
 0x268   : > { %v1357_v25 = vpop.eup %1356  ;;  %v998_v26 = vmul.f32 %v1355_v24, %v950_v57 }
 0x269   : > { %v999_v27 = vmul.f32 %v1357_v25, %v951_v53 }
 0x26a   : > { %1006 = vst [vmem:[%s369_s17 + $0x28] sm:$0xff] %v998_v26 }
 0x26b   : > { %v1359_v28 = vpop.eup %1358  ;;  %1007 = vst [vmem:[%s369_s17 + $0x30] sm:$0xff] %v999_v27 }
 0x26c   : > { %v1000_v29 = vmul.f32 %v1359_v28, %v952_v58 }
 0x26e   : > { %1008 = vst [vmem:[%s369_s17 + $0x38] sm:$0xff] %v1000_v29 }
 0x26f PF: > { %s17_s26 = sadd.s32 1, %s1382_s26   ;;  %s1587_s24 = smov %s1378_s25 }
 0x270   : > { %p14_p5 = scmp.ge.s32.totalorder %s17_s26, 4   ;;  %s1588_s25 = smov %s1590_s27 }
 0x272   :  { %16 = sbr.rel (!%p14_p5) target bundleno = 2 (0x2), region = 95 }

// kernel: graphsage_forward.2
= control target key start
LH: loop header
LB: loop body
LE: loop exit
PB: predicated region body
PF: predicated region fallthrough
CT: control target
= control target key end

     0   :  { %s1504_s24 = smov 0   ;;  %s1506_s25 = smov 0   ;;  %s1658_s0 = inlined_call_operand.vmem [shape: s8[128,128], index: 0, kind: input, shape index: {}]   ;;  %s1659_s1 = inlined_call_operand.vmem [shape: bf16[128,128], index: 1, kind: input, shape index: {}, may-alias: {1,2}]   ;;  %s1660_s2 = inlined_call_operand.vmem [shape: bf16[128,128], index: 2, kind: input, shape index: {}, may-alias: {1,2}]   ;;  %s1661_s3 = inlined_call_operand.vmem [shape: bf16[128,128], index: 3, kind: input, shape index: {}]   ;;  %s1662_s4 = inlined_call_operand.vmem [shape: bf16[128,128], index: 4, kind: input, shape index: {}]   ;;  %s1663_s5 = inlined_call_operand.vmem [shape: f32[1,128], index: 5, kind: input, shape index: {}]   ;;  %s1664_s6 = inlined_call_operand.vmem [shape: f32[128,1], index: 6, kind: input, shape index: {}]   ;;  %s1665_s7 = inlined_call_operand.vmem [shape: bf16[128,128], index: 7, kind: output, shape index: {}]  }
   0x1   :  { %s1508_s26 = smov 0  }
   0x2 LB: > { %s29_s27 = sadd.s32 1, %s1457_s25  ;;  %p1161_p0 = scmp.ge.s32.totalorder %s1461_s26, 1  ;;  %s1461_s26 = sphi %s1508_s26, %s17_s26   ;;  %s1457_s25 = sphi %s1506_s25, %s1667_s25   ;;  %s1453_s24 = sphi %s1504_s24, %s1666_s24  }
   0x3   : > { %p31_p1 = scmp.ge.s32.totalorder %s29_s27, 2  ;;  %p288_p2 = scmp.lt.s32.totalorder %s1461_s26, 3 }
   0x5   : > { %s1669_s27 = smov (%p31_p1, %s29_s27), 0  ;;  %p289_p3 = pnand %p1161_p0, %p288_p2 }
   0x6   : > { %s1162_s30 = sshll.u32 (!%p289_p3), %s1453_s24, 3 }
   0x7   : > { %292 = sbr.rel (%p289_p3) target bundleno = 627 (0x273), region = 48  ;;  %p339_p4 = scmp.lt.s32.totalorder (!%p289_p3), %s1162_s30, 15 }
   0xc   : > { %v1395_v0 = vld [vmem:[%s1659_s1 + $0x38] sm:$0xff]   ;;  %v1396_v1 = vld [vmem:[%s1659_s1 + $0x30] sm:$0xff]   ;;  %s1671_s30 = smov (!%p339_p4, %s1162_s30), 15  ;;  %v1463_v2 = vmov 0   ;;  %v1397_v3 = vld [vmem:[%s1659_s1 + $0x28] sm:$0xff]  }
   0xd   : > { %1280 = vmatprep.subr.bf16.mxu0 %v1395_v0  ;;  %1394 = vset.pattern.permute.xlu1 %v1463_v2  ;;  %s1163_s12 = sshll.u32 %s1671_s30, 1  ;;  %s1167_s16 = sshll.u32 %s1671_s30, 3  ;;  %v1398_v4 = vld [vmem:[%s1659_s1 + $0x20] sm:$0xff]   ;;  %v1399_v12 = vld [vmem:[%s1659_s1 + $0x18] sm:$0xff]   ;;  %v1400_v15 = vld [vmem:[%s1659_s1 + $0x10] sm:$0xff]  }
   0xe   : > { %1281 = vmatpush3.bf16.msra.mxu0 %v1395_v0  ;;  %1393 = vset.pattern.permute.xlu0 %v1463_v2  ;;  %s1537_s15 = scalar_lea.vmem %s1658_s0, %s1163_s12  ;;  %s1543_s19 = scalar_lea.vmem %s1664_s6, %s1167_s16  ;;  %v1403_v16 = vld [vmem:[%s1662_s4 + $0x38] sm:$0xff]   ;;  %v1404_v19 = vld [vmem:[%s1662_s4 + $0x30] sm:$0xff]   ;;  %v1401_v20 = vld [vmem:[%s1659_s1 + $0x8] sm:$0xff]  }
   0xf   : > { %1282 = vmatprep.subr.bf16.mxu0 %v1396_v1  ;;  %v384_v5 = vld [vmem:[%s1537_s15] sm:$0x3]  ;;  %v385_v6 = vld [vmem:[%s1537_s15 + $0x2] sm:$0x3]  ;;  %v585_v13 = vld [vmem:[%s1543_s19 + $0x28] sm:$0xff]  ;;  %1304 = vmatprep.subr.bf16.mxu1 %v1403_v16  ;;  %s1165_s11 = sshll.u32 %s1671_s30, 2 }
  0x10   : > { %v392_v7 = vunpack.c.l.s8.bf16 %v384_v5  ;;  %v393_v8 = vunpack.c.l.s8.bf16 %v385_v6  ;;  %v584_v9 = vld [vmem:[%s1543_s19 + $0x20] sm:$0xff]  ;;  %v581_v14 = vld [vmem:[%s1543_s19 + $0x8] sm:$0xff]  ;;  %v583_v17 = vld [vmem:[%s1543_s19 + $0x18] sm:$0xff]  ;;  %1305 = vmatpush3.bf16.msra.mxu1 %v1403_v16  ;;  %s1579_s17 = scalar_lea.vmem %s1660_s2, %s1165_s11  ;;  %s369_s16 = scalar_lea.vmem %s1665_s7, %s1165_s11 }
  0x11   : > { %779 = vperm.xlu1 %1394, %v584_v9   ;;  %v580_v11 = vld [vmem:[%s1543_s19] sm:$0xff]  ;;  %v582_v18 = vld [vmem:[%s1543_s19 + $0x10] sm:$0xff]  ;;  %v587_v21 = vld [vmem:[%s1543_s19 + $0x38] sm:$0xff]  ;;  %1306 = vmatprep.subr.bf16.mxu1 %v1404_v19 }
  0x12   : > { %1283 = vmatpush3.bf16.msra.mxu0 %v1396_v1  ;;  %v1170_v10 = vcombine.low %v392_v7, %v393_v8  ;;  %759 = vperm.xlu0 %1393, %v580_v11   ;;  %v586_v22 = vld [vmem:[%s1543_s19 + $0x30] sm:$0xff]  ;;  %v386_v23 = vld [vmem:[%s1537_s15 + $0x4] sm:$0x3]  ;;  %v387_v24 = vld [vmem:[%s1537_s15 + $0x6] sm:$0x3] }
  0x13   : > { %1284 = vmatprep.subr.bf16.mxu0 %v1397_v3  ;;  %v1405_v25 = vld [vmem:[%s1662_s4 + $0x28] sm:$0xff]   ;;  %v1402_v26 = vld [vmem:[%s1659_s1] sm:$0xff]   ;;  %v394_v31 = vunpack.c.l.s8.bf16 %v386_v23  ;;  %v395_v32 = vunpack.c.l.s8.bf16 %v387_v24  ;;  %v1407_v35 = vld [vmem:[%s1662_s4 + $0x18] sm:$0xff]  }
  0x14   : > { %1296 = vmatprep.mubr.bf16.mxu0 %v1170_v10  ;;  %v388_v27 = vld [vmem:[%s1537_s15 + $0x8] sm:$0x3]  ;;  %1307 = vmatpush3.bf16.msra.mxu1 %v1404_v19  ;;  %v1406_v28 = vld [vmem:[%s1662_s4 + $0x20] sm:$0xff]   ;;  %v389_v30 = vld [vmem:[%s1537_s15 + $0xa] sm:$0x3] }
  0x15   : > { %784 = vperm.xlu1 %1394, %v585_v13   ;;  %v1412_v29 = vld [vmem:[%s1579_s17] sm:$0xff]   ;;  %1308 = vmatprep.subr.bf16.mxu1 %v1405_v25  ;;  %v396_v33 = vunpack.c.l.s8.bf16 %v388_v27  ;;  %v397_v34 = vunpack.c.l.s8.bf16 %v389_v30  ;;  %v1411_v36 = vld [vmem:[%s1661_s3 + $0x38] sm:$0xff]   ;;  %v390_v37 = vld [vmem:[%s1537_s15 + $0xc] sm:$0x3]  ;;  %v1171_v39 = vcombine.low %v394_v31, %v395_v32 }
  0x16   : > { %1285 = vmatpush3.bf16.msra.mxu0 %v1397_v3  ;;  %764 = vperm.xlu0 %1393, %v581_v14   ;;  %v391_v38 = vld [vmem:[%s1537_s15 + $0xe] sm:$0x3]  ;;  %v1408_v41 = vld [vmem:[%s1662_s4 + $0x10] sm:$0xff]   ;;  %v398_v43 = vunpack.c.l.s8.bf16 %v390_v37  ;;  %v1410_v48 = vld [vmem:[%s1662_s4] sm:$0xff]  }
  0x17   : > { %1286 = vmatprep.subr.bf16.mxu0 %v1398_v4  ;;  %1320 = vmatprep.mubr.bf16.mxu1 %v1412_v29  ;;  %v1172_v40 = vcombine.low %v396_v33, %v397_v34  ;;  %v1414_v42 = vld [vmem:[%s1661_s3 + $0x30] sm:$0xff]   ;;  %v399_v44 = vunpack.c.l.s8.bf16 %v391_v38  ;;  %v1409_v45 = vld [vmem:[%s1662_s4 + $0x8] sm:$0xff]   ;;  %v1416_v49 = vld [vmem:[%s1661_s3 + $0x20] sm:$0xff]  }
  0x18   : > { %1309 = vmatpush3.bf16.msra.mxu1 %v1405_v25  ;;  %v1415_v46 = vld [vmem:[%s1661_s3 + $0x28] sm:$0xff]   ;;  %v1417_v51 = vld [vmem:[%s1661_s3 + $0x18] sm:$0xff]   ;;  %v1418_v52 = vld [vmem:[%s1661_s3 + $0x10] sm:$0xff]  }
  0x19   : > { %774 = vperm.xlu1 %1394, %v583_v17   ;;  %1310 = vmatprep.subr.bf16.mxu1 %v1406_v28  ;;  %v1173_v47 = vcombine.low %v398_v43, %v399_v44  ;;  %v1413_v50 = vld [vmem:[%s1579_s17 + $0x8] sm:$0xff]   ;;  %v1420_v54 = vld [vmem:[%s1579_s17 + $0x10] sm:$0xff]   ;;  %v1421_v55 = vld [vmem:[%s1579_s17 + $0x18] sm:$0xff]  }
  0x1a   : > { %1287 = vmatpush3.bf16.msra.mxu0 %v1398_v4  ;;  %769 = vperm.xlu0 %1393, %v582_v18   ;;  %v1419_v53 = vld [vmem:[%s1661_s3 + $0x8] sm:$0xff]   ;;  %v1422_v56 = vld [vmem:[%s1661_s3] sm:$0xff]  }
  0x1b   : > { %1288 = vmatprep.subr.bf16.mxu0 %v1399_v12 }
  0x1c   : > { %1311 = vmatpush3.bf16.msra.mxu1 %v1406_v28  ;;  %v1202_v28 = vld [vmem:[%s1663_s5] ss:$0 sm:$0xff] }
  0x1d   : > { %794 = vperm.xlu1 %1394, %v587_v21   ;;  %1312 = vmatprep.subr.bf16.mxu1 %v1407_v35 }
  0x1e   : > { %1289 = vmatpush3.bf16.msra.mxu0 %v1399_v12  ;;  %789 = vperm.xlu0 %1393, %v586_v22  }
  0x1f   : > { %1290 = vmatprep.subr.bf16.mxu0 %v1400_v15 }
  0x20   : > { %1313 = vmatpush3.bf16.msra.mxu1 %v1407_v35 }
  0x21   : > { %1314 = vmatprep.subr.bf16.mxu1 %v1408_v41 }
  0x22   : > { %1291 = vmatpush3.bf16.msra.mxu0 %v1400_v15 }
  0x23   : > { %1292 = vmatprep.subr.bf16.mxu0 %v1401_v20 }
  0x24   : > { %1315 = vmatpush3.bf16.msra.mxu1 %v1408_v41 }
  0x25   : > { %1316 = vmatprep.subr.bf16.mxu1 %v1409_v45 }
  0x26   : > { %1293 = vmatpush3.bf16.msra.mxu0 %v1401_v20 }
  0x27   : > { %1294 = vmatprep.subr.bf16.mxu0 %v1402_v26 }
  0x28   : > { %1317 = vmatpush3.bf16.msra.mxu1 %v1409_v45 }
  0x29   : > { %1318 = vmatprep.subr.bf16.mxu1 %v1410_v48 }
  0x2a   : > { %1295 = vmatpush3.bf16.msra.mxu0 %v1402_v26 }
  0x2b   : > { %1328 = vmatprep.subr.bf16.mxu0 %v1411_v36 }
  0x2c   : > { %1319 = vmatpush3.bf16.msra.mxu1 %v1410_v48 }
  0x2d   : > { %1297 = vmatmul.mubr.bf16.vlgmr.msra.gmra.mxu0 %v1171_v39  ;;  %1352 = vmatprep.subr.bf16.mxu1 %v1411_v36 }
  0x2e   : > { %1300 = vmatprep.mubr.bf16.mxu0 %v1172_v40  ;;  %1329 = vmatpush3.bf16.msra.mxu0 %v1411_v36 }
  0x2f   : > { %1330 = vmatprep.subr.bf16.mxu0 %v1414_v42  ;;  %1321 = vmatmul.mubr.bf16.vlgmr.msra.gmra.mxu1 %v1413_v50 }
  0x30   : > { %1360 = vmatpush3.bf16.msra.mxu1 %v1411_v36  ;;  %1324 = vmatprep.mubr.bf16.mxu1 %v1420_v54 }
  0x31   : > { %1353 = vmatprep.subr.bf16.mxu1 %v1414_v42 }
  0x32   : > { %1331 = vmatpush3.bf16.msra.mxu0 %v1414_v42 }
  0x33   : > { %1332 = vmatprep.subr.bf16.mxu0 %v1415_v46 }
  0x34   : > { %1361 = vmatpush3.bf16.msra.mxu1 %v1414_v42 }
  0x35   : > { %1301 = vmatmul.mubr.bf16.gmra.mxu0 %v1173_v47  ;;  %1354 = vmatprep.subr.bf16.mxu1 %v1415_v46 }
  0x36   : > { %1333 = vmatpush3.bf16.msra.mxu0 %v1415_v46 }
  0x37   : > { %1334 = vmatprep.subr.bf16.mxu0 %v1416_v49  ;;  %1325 = vmatmul.mubr.bf16.gmra.mxu1 %v1421_v55 }
  0x38   : > { %1362 = vmatpush3.bf16.msra.mxu1 %v1415_v46 }
  0x39   : > { %1355 = vmatprep.subr.bf16.mxu1 %v1416_v49 }
  0x3a   : > { %1335 = vmatpush3.bf16.msra.mxu0 %v1416_v49 }
  0x3b   : > { %1336 = vmatprep.subr.bf16.mxu0 %v1417_v51 }
  0x3c   : > { %1363 = vmatpush3.bf16.msra.mxu1 %v1416_v49 }
  0x3d   : > { %1356 = vmatprep.subr.bf16.mxu1 %v1417_v51 }
  0x3e   : > { %1337 = vmatpush3.bf16.msra.mxu0 %v1417_v51 }
  0x3f   : > { %1338 = vmatprep.subr.bf16.mxu0 %v1418_v52 }
  0x40   : > { %1364 = vmatpush3.bf16.msra.mxu1 %v1417_v51 }
  0x41   : > { %1357 = vmatprep.subr.bf16.mxu1 %v1418_v52 }
  0x42   : > { %1339 = vmatpush3.bf16.msra.mxu0 %v1418_v52 }
  0x43   : > { %1340 = vmatprep.subr.bf16.mxu0 %v1419_v53 }
  0x44   : > { %1365 = vmatpush3.bf16.msra.mxu1 %v1418_v52 }
  0x45   : > { %1358 = vmatprep.subr.bf16.mxu1 %v1419_v53 }
  0x46   : > { %1341 = vmatpush3.bf16.msra.mxu0 %v1419_v53 }
  0x47   : > { %1342 = vmatprep.subr.bf16.mxu0 %v1422_v56 }
  0x48   : > { %1366 = vmatpush3.bf16.msra.mxu1 %v1419_v53 }
  0x49   : > { %1359 = vmatprep.subr.bf16.mxu1 %v1422_v56 }
  0x4a   : > { %1343 = vmatpush3.bf16.msra.mxu0 %v1422_v56 }
  0x4c   : > { %1367 = vmatpush3.bf16.msra.mxu1 %v1422_v56 }
  0x8c   : > { %v780_v57 = vpop.permute.xlu1 %779 }
  0x8d   : > { %v760_v58 = vpop.permute.xlu0 %759 }
  0x90   : > { %v785_v59 = vpop.permute.xlu1 %784 }
  0x91   : > { %v765_v61 = vpop.permute.xlu0 %764 }
  0x94   : > { %v775_v0 = vpop.permute.xlu1 %774 }
  0x95   : > { %v770_v3 = vpop.permute.xlu0 %769 }
  0x98   : > { %v795_v12 = vpop.permute.xlu1 %794 }
  0x99   : > { %v790_v15 = vpop.permute.xlu0 %789 }
  0xed   : > { %v1298_v60 = vpop.f32.mrf.mxu0 }
  0xee   : > { %v799_v6 = vmul.f32 %v1298_v60, %v770_v3 }
  0xef   : > { %v530_v62 = vpop.f32.mrf.mxu0  ;;  %v1322_v21 = vpop.f32.mrf.mxu1 }
  0xf0   : > { %v797_v4 = vmul.f32 %v760_v58, %v530_v62 }
  0xf1   : > { %v1299_v63 = vpop.f32.mrf.mxu0  ;;  %v718_v22 = vpop.f32.mrf.mxu1 }
  0xf2   : > { %v800_v1 = vmul.f32 %v1299_v63, %v775_v0 }
  0xf3   : > { %v533_v2 = vpop.f32.mrf.mxu0  ;;  %v1323_v23 = vpop.f32.mrf.mxu1 }
  0xf4   : > { %v798_v5 = vmul.f32 %v765_v61, %v533_v2  ;;  %v806_v9 = vpack.c.bf16 %v800_v1, %v799_v6 }
  0xf5   : > { %v1302_v7 = vpop.f32.mrf.mxu0  ;;  %v721_v24 = vpop.f32.mrf.mxu1 }
  0xf6   : > { %v805_v8 = vpack.c.bf16 %v798_v5, %v797_v4  ;;  %v803_v18 = vmul.f32 %v1302_v7, %v790_v15 }
  0xf7   : > { %v546_v10 = vpop.f32.mrf.mxu0  ;;  %v1326_v25 = vpop.f32.mrf.mxu1 }
  0xf8   : > { %1344 = vmatprep.mubr.bf16.mxu0 %v805_v8  ;;  %v801_v16 = vmul.f32 %v780_v57, %v546_v10 }
  0xf9   : > { %v1303_v11 = vpop.f32.mrf.mxu0  ;;  %1345 = vmatmul.mubr.bf16.vlgmr.msra.gmra.mxu0 %v806_v9  ;;  %v734_v26 = vpop.f32.mrf.mxu1 }
  0xfa   : > { %v804_v13 = vmul.f32 %v1303_v11, %v795_v12 }
  0xfb   : > { %v549_v14 = vpop.f32.mrf.mxu0  ;;  %v1327_v30 = vpop.f32.mrf.mxu1 }
  0xfc   : > { %v802_v17 = vmul.f32 %v785_v59, %v549_v14  ;;  %v808_v20 = vpack.c.bf16 %v804_v13, %v803_v18 }
  0xfd   : > { %v737_v38 = vpop.f32.mrf.mxu1 }
  0xfe   : > { %v807_v19 = vpack.c.bf16 %v802_v17, %v801_v16 }
 0x100   : > { %1348 = vmatprep.mubr.bf16.mxu1 %v807_v19 }
 0x101   : > { %1349 = vmatmul.mubr.bf16.vlgmr.msra.gmra.mxu1 %v808_v20 }
 0x1b9   : > { %v1346_v27 = vpop.f32.mrf.mxu0 }
 0x1ba   : > { %v916_v29 = vadd.f32 %v1346_v27, %v1322_v21 }
 0x1bb   : > { %v907_v31 = vpop.f32.mrf.mxu0 }
 0x1bc   : > { %v1639_v32 = vadd.f32 %v1202_v28, %v916_v29  ;;  %v908_v33 = vadd.f32 %v907_v31, %v718_v22 }
 0x1bd   : > { %v1347_v34 = vpop.f32.mrf.mxu0 }
 0x1be   : > { %v945_v35 = vadd.f32 %v1202_v28, %v908_v33  ;;  %v919_v36 = vadd.f32 %v1347_v34, %v1323_v23  ;;  %v955_v37 = vmul.f32 %v1639_v32, %v1639_v32 }
 0x1bf   : > { %v910_v39 = vpop.f32.mrf.mxu0 }
 0x1c0   : > { %v911_v40 = vadd.f32 %v910_v39, %v721_v24  ;;  %965 = vadd.xlane.f32.xlu0 %v955_v37  ;;  %v948_v42 = vadd.f32 %v1202_v28, %v919_v36  ;;  %v953_v44 = vmul.f32 %v945_v35, %v945_v35 }
 0x1c1   : > { %v1350_v41 = vpop.f32.mrf.mxu1 }
 0x1c2   : > { %v946_v43 = vadd.f32 %v1202_v28, %v911_v40  ;;  %v932_v46 = vadd.f32 %v1350_v41, %v1326_v25  ;;  %v956_v51 = vmul.f32 %v948_v42, %v948_v42 }
 0x1c3   : > { %v923_v45 = vpop.f32.mrf.mxu1 }
 0x1c4   : > { %v924_v47 = vadd.f32 %v923_v45, %v734_v26  ;;  %961 = vadd.xlane.f32.xlu0 %v953_v44  ;;  %v954_v48 = vmul.f32 %v946_v43, %v946_v43  ;;  %v951_v53 = vadd.f32 %v1202_v28, %v932_v46 }
 0x1c5   : > { %v1351_v49 = vpop.f32.mrf.mxu1 }
 0x1c6   : > { %v949_v50 = vadd.f32 %v1202_v28, %v924_v47  ;;  %963 = vadd.xlane.f32.xlu1 %v954_v48  ;;  %v935_v54 = vadd.f32 %v1351_v49, %v1327_v30  ;;  %v959_v60 = vmul.f32 %v951_v53, %v951_v53 }
 0x1c7   : > { %v926_v52 = vpop.f32.mrf.mxu1 }
 0x1c8   : > { %v927_v55 = vadd.f32 %v926_v52, %v737_v38  ;;  %967 = vadd.xlane.f32.xlu0 %v956_v51  ;;  %v957_v56 = vmul.f32 %v949_v50, %v949_v50  ;;  %v952_v58 = vadd.f32 %v1202_v28, %v935_v54 }
 0x1ca   : > { %v950_v57 = vadd.f32 %v1202_v28, %v927_v55  ;;  %969 = vadd.xlane.f32.xlu1 %v957_v56  ;;  %v960_v61 = vmul.f32 %v952_v58, %v952_v58 }
 0x1cc   : > { %v958_v59 = vmul.f32 %v950_v57, %v950_v57 }
 0x1ce   : > { %971 = vadd.xlane.f32.xlu0 %v958_v59  ;;  %973 = vadd.xlane.f32.xlu1 %v959_v60 }
 0x1d2   : > { %975 = vadd.xlane.f32.xlu0 %v960_v61 }
 0x249   : > { %v966_v62 = vpop.xlane.xlu0 %965 }
 0x24a   : > { %v979_v63 = vmax.f32 %v966_v62, 1e-24 }
 0x24c   : > { %1423 = vrsqrt.f32 %v979_v63 }
 0x24d   : > { %v962_v0 = vpop.xlane.xlu0 %961 }
 0x24e   : > { %v977_v1 = vmax.f32 %v962_v0, 1e-24 }
 0x24f   : > { %v964_v2 = vpop.xlane.xlu1 %963 }
 0x250   : > { %1425 = vrsqrt.f32 %v977_v1  ;;  %v978_v3 = vmax.f32 %v964_v2, 1e-24 }
 0x251   : > { %v968_v4 = vpop.xlane.xlu0 %967 }
 0x252   : > { %1427 = vrsqrt.f32 %v978_v3  ;;  %v980_v5 = vmax.f32 %v968_v4, 1e-24 }
 0x253   : > { %v970_v6 = vpop.xlane.xlu1 %969 }
 0x254   : > { %1429 = vrsqrt.f32 %v980_v5  ;;  %v981_v7 = vmax.f32 %v970_v6, 1e-24 }
 0x256   : > { %1431 = vrsqrt.f32 %v981_v7 }
 0x257   : > { %v972_v8 = vpop.xlane.xlu0 %971  ;;  %v974_v9 = vpop.xlane.xlu1 %973 }
 0x258   : > { %v982_v10 = vmax.f32 %v972_v8, 1e-24  ;;  %v983_v11 = vmax.f32 %v974_v9, 1e-24 }
 0x259   : > { %v1424_v13 = vpop.eup %1423 }
 0x25a   : > { %1433 = vrsqrt.f32 %v982_v10  ;;  %v995_v18 = vmul.f32 %v1424_v13, %v1639_v32 }
 0x25b   : > { %1435 = vrsqrt.f32 %v983_v11  ;;  %v976_v12 = vpop.xlane.xlu0 %975 }
 0x25c   : > { %v984_v14 = vmax.f32 %v976_v12, 1e-24  ;;  %v1003_v25 = vmax.f32 %v995_v18, 0.0 }
 0x25d   : > { %v1426_v15 = vpop.eup %1425 }
 0x25e   : > { %v993_v16 = vmul.f32 %v1426_v15, %v945_v35  ;;  %1437 = vrsqrt.f32 %v984_v14 }
 0x25f   : > { %v1428_v17 = vpop.eup %1427 }
 0x260   : > { %v994_v19 = vmul.f32 %v1428_v17, %v946_v43  ;;  %v1001_v21 = vmax.f32 %v993_v16, 0.0 }
 0x261   : > { %v1430_v20 = vpop.eup %1429 }
 0x262   : > { %v1002_v22 = vmax.f32 %v994_v19, 0.0  ;;  %v996_v23 = vmul.f32 %v1430_v20, %v948_v42 }
 0x263   : > { %v1432_v24 = vpop.eup %1431 }
 0x264   : > { %v1224_v26 = vpack.c.bf16 %v1002_v22, %v1001_v21  ;;  %v1004_v27 = vmax.f32 %v996_v23, 0.0  ;;  %v997_v29 = vmul.f32 %v1432_v24, %v949_v50 }
 0x266   : > { %1225 = vst [vmem:[%s369_s16] sm:$0xff] %v1224_v26   ;;  %v1229_v28 = vpack.c.bf16 %v1004_v27, %v1003_v25  ;;  %v1005_v33 = vmax.f32 %v997_v29, 0.0 }
 0x267   : > { %v1434_v30 = vpop.eup %1433 }
 0x268   : > { %v1436_v31 = vpop.eup %1435  ;;  %1241 = vst [vmem:[%s369_s16 + $0x8] sm:$0xff] %v1229_v28   ;;  %v998_v32 = vmul.f32 %v1434_v30, %v950_v57 }
 0x269   : > { %v999_v35 = vmul.f32 %v1436_v31, %v951_v53 }
 0x26a   : > { %v1006_v34 = vmax.f32 %v998_v32, 0.0 }
 0x26b   : > { %v1438_v36 = vpop.eup %1437  ;;  %v1007_v39 = vmax.f32 %v999_v35, 0.0 }
 0x26c   : > { %v1234_v37 = vpack.c.bf16 %v1006_v34, %v1005_v33  ;;  %v1000_v38 = vmul.f32 %v1438_v36, %v952_v58 }
 0x26e   : > { %1242 = vst [vmem:[%s369_s16 + $0x10] sm:$0xff] %v1234_v37   ;;  %v1008_v40 = vmax.f32 %v1000_v38, 0.0 }
 0x270   : > { %v1239_v41 = vpack.c.bf16 %v1008_v40, %v1007_v39 }
 0x272   : > { %1243 = vst [vmem:[%s369_s16 + $0x18] sm:$0xff] %v1239_v41  }
 0x273 PF: > { %s17_s26 = sadd.s32 1, %s1461_s26   ;;  %s1666_s24 = smov %s1457_s25 }
 0x274   : > { %p14_p5 = scmp.ge.s32.totalorder %s17_s26, 4   ;;  %s1667_s25 = smov %s1669_s27 }
 0x276   :  { %16 = sbr.rel (!%p14_p5) target bundleno = 2 (0x2), region = 95 }

</bundles_post_ra>
